<compile_context>
chip_gen: v7x
topology: tpu7x:2x2x1
jax: 0.10.0
libtpu: 0.0.40
codegen_flags: <defaults>
</compile_context>

<pallas_src>
import functools

import jax
import jax.numpy as jnp
from jax import lax
from jax.experimental import pallas as pl
from jax.experimental.pallas import tpu as pltpu

BN_EPS = 1e-5


# ----------------------- banded 3x3 weight construction -----------------------
def build_banded_weight(w, W):
    """Fold the 3 horizontal taps (and the horizontal 'SAME' zero padding) of a
    3x3 HWIO conv weight into a block-banded matrix per kernel row dy:

        out[h, w_out*Cout + o] = sum_{w_in, c}
            x[h + dy - 1, w_in*Cin + c] * band[dy, w_in*Cin + c, w_out*Cout + o]

    band[dy] has the (Cin, Cout) tap w[dy, dx] on block-diagonal offset 1 - dx.
    Built once in plain JAX (tiny), consumed as bf16 by the MXU.
    """
    KH, KW, Cin, Cout = w.shape
    bands = []
    for dy in range(KH):
        band = jnp.zeros((W * Cin, W * Cout), jnp.float32)
        for dx in range(KW):
            # tap dx reads input pixel w_in = w_out + dx - 1  ->  diagonal k = 1 - dx
            sel = jnp.eye(W, k=1 - dx, dtype=jnp.float32)
            blk = jnp.einsum("wv,co->wcvo", sel, w[dy, dx].astype(jnp.float32))
            band = band + blk.reshape(W * Cin, W * Cout)
        bands.append(band)
    return jnp.stack(bands).astype(jnp.bfloat16)           # (3, W*Cin, W*Cout)


# --------------------- Conv3x3 (+ fused BN stats) kernel ---------------------
def _conv3x3_kernel(*refs, fuse_input_affine: bool):
    if fuse_input_affine:
        x_ref, scale_ref, shift_ref, w_ref, o_ref, ssum_ref, ssq_ref = refs
    else:
        x_ref, w_ref, o_ref, ssum_ref, ssq_ref = refs
        scale_ref = shift_ref = None

    H = o_ref.shape[1]
    WCout = o_ref.shape[2]

    xin = x_ref[0].astype(jnp.float32)                     # (H, W*Cin), lane-dense
    if fuse_input_affine:
        # Previous stage's BatchNorm + ReLU fused into this conv's input load.
        xin = jnp.maximum(xin * scale_ref[...] + shift_ref[...], 0.0)
    xb = xin.astype(jnp.bfloat16)                          # cast once for the MXU

    # Vertical 'SAME' padding = one zero-row shifted slab per dy (register
    # level; no VMEM halo scratch, no per-step scratch zeroing).  Horizontal
    # taps + padding live entirely in the banded weights, so each dy is one
    # lane-dense MXU matmul into a single (H, W*Cout) f32 accumulator.
    zrow = jnp.zeros((1, xb.shape[1]), xb.dtype)
    slabs = (jnp.concatenate([zrow, xb[:-1]], axis=0),     # dy=0: reads row h-1
             xb,                                           # dy=1: reads row h
             jnp.concatenate([xb[1:], zrow], axis=0))      # dy=2: reads row h+1

    acc = jnp.zeros((H, WCout), jnp.float32)
    for dy in range(3):
        acc = acc + jnp.dot(slabs[dy], w_ref[dy],
                            preferred_element_type=jnp.float32)

    o_ref[0] = acc.astype(o_ref.dtype)                     # lane-dense store
    # Fused BatchNorm partial statistics per (w, channel) lane; the tiny
    # cross-batch / cross-W reduction finishes in plain JAX outside.
    ssum_ref[0] = jnp.sum(acc, axis=0, keepdims=True)
    ssq_ref[0] = jnp.sum(acc * acc, axis=0, keepdims=True)


def conv3x3_bn_stats(x, wband, *, in_scale=None, in_shift=None,
                     out_dtype=jnp.bfloat16):
    """Bias-free 3x3 'SAME' conv over lane-dense (N, H, W*Cin) activations (the
    conv bias cancels inside training-mode BN), optionally with the previous
    stage's BN+ReLU fused into the input load.  Also emits per-lane sum /
    sum-of-squares so BN statistics come out of the conv pass for free."""
    N, H, WCin = x.shape
    WCout = wband.shape[-1]
    fuse = in_scale is not None
    kernel = functools.partial(_conv3x3_kernel, fuse_input_affine=fuse)

    in_specs = [pl.BlockSpec((1, H, WCin), lambda n: (n, 0, 0))]
    args = [x]
    if fuse:
        in_specs += [pl.BlockSpec((1, WCin), lambda n: (0, 0)),
                     pl.BlockSpec((1, WCin), lambda n: (0, 0))]
        args += [in_scale, in_shift]
    in_specs += [pl.BlockSpec((3, WCin, WCout), lambda n: (0, 0, 0))]
    args += [wband]

    y, ssum, ssq = pl.pallas_call(
        kernel,
        out_shape=(jax.ShapeDtypeStruct((N, H, WCout), out_dtype),
                   jax.ShapeDtypeStruct((N, 1, WCout), jnp.float32),
                   jax.ShapeDtypeStruct((N, 1, WCout), jnp.float32)),
        grid_spec=pltpu.PrefetchScalarGridSpec(
            num_scalar_prefetch=0,
            grid=(N,),
            in_specs=in_specs,
            out_specs=[pl.BlockSpec((1, H, WCout), lambda n: (n, 0, 0)),
                       pl.BlockSpec((1, 1, WCout), lambda n: (n, 0, 0)),
                       pl.BlockSpec((1, 1, WCout), lambda n: (n, 0, 0))],
        ),
        compiler_params=pltpu.CompilerParams(
            dimension_semantics=("parallel",),
            vmem_limit_bytes=32 * 1024 * 1024),
    )(*args)
    return y, ssum, ssq
    # TODO(synk): at production H/W/C the banded-weight trick stops paying
    # ((W*Cin, W*Cout) weights grow quadratically in W); switch to a direct MXU
    # path with the 3 dy taps merged into a K=3*Cin contraction, Cout tiled in
    # multiples of 256, and an H-tile grid axis (1-row halo) so double-buffered
    # blocks stay inside v7x's 64 MiB VMEM and feed both TensorCores.


# -------------------- BN scale/shift from fused statistics -------------------
def _bn_scale_shift(ssum, ssq, gamma, beta, count, W, C):
    total = jnp.sum(ssum.reshape(-1, W, C), axis=(0, 1))
    total_sq = jnp.sum(ssq.reshape(-1, W, C), axis=(0, 1))
    mean = total / count
    # TODO(synk): E[x^2]-E[x]^2 in f32 can cancel when |mean| >> std; use a
    # shifted / Welford-style reduction for production-scale activations.
    var = jnp.maximum(total_sq / count - mean * mean, 0.0)   # biased var (training BN)
    inv = lax.rsqrt(var + BN_EPS)
    scale = gamma.astype(jnp.float32) * inv
    shift = beta.astype(jnp.float32) - mean * scale
    # Tile channel-fastest to (1, W*C) so the kernels apply it lane-dense.
    return (jnp.tile(scale, W).reshape(1, W * C),
            jnp.tile(shift, W).reshape(1, W * C))


# ------------------------ BN affine + ReLU apply kernel -----------------------
def _bn_relu_apply_kernel(x_ref, scale_ref, shift_ref, o_ref):
    x = x_ref[...].astype(jnp.float32)                     # (1, H, W*C), lane-dense
    scale = scale_ref[...].reshape(1, 1, -1)
    shift = shift_ref[...].reshape(1, 1, -1)
    o_ref[...] = jnp.maximum(x * scale + shift, 0.0).astype(o_ref.dtype)


def bn_relu_apply(x, scale, shift, out_dtype=jnp.float32):
    N, H, WC = x.shape
    return pl.pallas_call(
        _bn_relu_apply_kernel,
        out_shape=jax.ShapeDtypeStruct((N, H, WC), out_dtype),
        grid_spec=pltpu.PrefetchScalarGridSpec(
            num_scalar_prefetch=0,
            grid=(N,),
            in_specs=[pl.BlockSpec((1, H, WC), lambda n: (n, 0, 0)),
                      pl.BlockSpec((1, WC), lambda n: (0, 0)),
                      pl.BlockSpec((1, WC), lambda n: (0, 0))],
            out_specs=pl.BlockSpec((1, H, WC), lambda n: (n, 0, 0)),
        ),
        compiler_params=pltpu.CompilerParams(
            dimension_semantics=("parallel",),
            vmem_limit_bytes=32 * 1024 * 1024),
    )(x, scale, shift)


# --------------------------------- Conv_Block ---------------------------------
def conv_block_forward(x_nchw, params):
    # PyTorch NCHW -> lane-dense (N, H, W*C); back to NCHW at the very end.
    N, Cin, H, W = x_nchw.shape
    Cout = params["w1"].shape[-1]
    x = jnp.transpose(x_nchw, (0, 2, 3, 1)).astype(jnp.float32).reshape(N, H, W * Cin)
    count = float(N * H * W)

    wband1 = build_banded_weight(params["w1"], W)          # (3, W*Cin,  W*Cout)
    wband2 = build_banded_weight(params["w2"], W)          # (3, W*Cout, W*Cout)

    # Stage 1: conv1 + fused BN1 statistics.  Conv bias is dropped: a per-channel
    # constant added before training-mode BatchNorm cancels exactly in (x - mean).
    h1, s1, q1 = conv3x3_bn_stats(x, wband1)
    scale1, shift1 = _bn_scale_shift(s1, q1, params["g1"], params["beta1"],
                                     count, W, Cout)

    # Stage 2: BN1 + ReLU fused into conv2's input load, + fused BN2 statistics.
    h2, s2, q2 = conv3x3_bn_stats(h1, wband2, in_scale=scale1, in_shift=shift1)
    scale2, shift2 = _bn_scale_shift(s2, q2, params["g2"], params["beta2"],
                                     count, W, Cout)

    # Stage 3: BN2 + ReLU as a lane-dense elementwise pass.
    y = bn_relu_apply(h2, scale2, shift2, out_dtype=jnp.float32)
    y = y.reshape(N, H, W, Cout)
    return jnp.transpose(y, (0, 3, 1, 2))
    # TODO(synk): BatchNorm running_mean/running_var momentum updates and the
    # optional Dropout branch (enable_dropout=True) are training-side state not
    # produced here; the trailing NCHW transpose is left to XLA (one extra HBM
    # pass) -- emit NCHW directly from bn_relu_apply if the consumer requires it.


# ------------------------------ pure-JAX reference -----------------------------
def _ref_conv(x, w, b):
    y = lax.conv_general_dilated(
        x, w, window_strides=(1, 1), padding="SAME",
        dimension_numbers=("NHWC", "HWIO", "NHWC"))
    return y + b[None, None, None, :]


def _ref_bn_relu(x, g, beta):
    mean = jnp.mean(x, axis=(0, 1, 2), keepdims=True)
    var = jnp.mean((x - mean) ** 2, axis=(0, 1, 2), keepdims=True)
    y = (x - mean) / jnp.sqrt(var + BN_EPS) * g + beta
    return jnp.maximum(y, 0.0)


def conv_block_ref(x_nchw, p):
    x = jnp.transpose(x_nchw, (0, 2, 3, 1))
    h = _ref_conv(x, p["w1"], p["b1"])
    h = _ref_bn_relu(h, p["g1"], p["beta1"])
    h = _ref_conv(h, p["w2"], p["b2"])
    h = _ref_bn_relu(h, p["g2"], p["beta2"])
    return jnp.transpose(h, (0, 3, 1, 2))


if __name__ == "__main__":
    key = jax.random.PRNGKey(0)
    N, Cin, Cout, H, W = 2, 4, 8, 16, 16

    ks = jax.random.split(key, 7)
    x = jax.random.normal(ks[0], (N, Cin, H, W), jnp.float32)      # NCHW like PyTorch
    params = {
        "w1": jax.random.normal(ks[1], (3, 3, Cin, Cout), jnp.float32) * 0.1,
        "b1": jax.random.normal(ks[2], (Cout,), jnp.float32) * 0.1,
        "g1": jnp.ones((Cout,), jnp.float32) + 0.05 * jax.random.normal(ks[3], (Cout,)),
        "beta1": 0.05 * jax.random.normal(ks[4], (Cout,)),
        "w2": jax.random.normal(ks[5], (3, 3, Cout, Cout), jnp.float32) * 0.1,
        "b2": jax.random.normal(ks[6], (Cout,), jnp.float32) * 0.1,
        "g2": jnp.ones((Cout,), jnp.float32),
        "beta2": jnp.zeros((Cout,), jnp.float32),
    }

    out = jax.block_until_ready(conv_block_forward(x, params))
    ref = jax.block_until_ready(conv_block_ref(x, params))

    assert out.shape == (N, Cout, H, W), out.shape
    max_err = float(jnp.max(jnp.abs(out - ref)))
    # bf16 MXU operands + bf16 intermediates -> loosened tolerance vs f32 reference.
    assert jnp.allclose(out, ref, atol=5e-2, rtol=5e-2), max_err
    print("KERNEL_OK")
</pallas_src>

<mosaic_0001>
module attributes {stable_mosaic.version = 11 : i64} {
  func.func @_conv3x3_kernel(%arg0: i32, %arg1: memref<1x16x64xf32, #tpu.memory_space<vmem>>, %arg2: memref<3x64x128xbf16, #tpu.memory_space<vmem>>, %arg3: memref<1x16x128xbf16, #tpu.memory_space<vmem>>, %arg4: memref<1x1x128xf32, #tpu.memory_space<vmem>>, %arg5: memref<1x1x128xf32, #tpu.memory_space<vmem>>) attributes {dimension_semantics = [#tpu.dimension_semantics<parallel>], iteration_bounds = array<i64: 2>, scalar_prefetch = 0 : i64, scratch_operands = 0 : i64, tpu.core_type = #tpu.core_type<tc>, window_params = [{transform_indices = @transform_0, window_bounds = array<i64: 1, 16, 64>}, {pipeline_mode = #tpu.pipeline_mode<synchronous>, transform_indices = @transform_1, window_bounds = array<i64: 3, 64, 128>}, {transform_indices = @transform_2, window_bounds = array<i64: 1, 16, 128>}, {transform_indices = @transform_3, window_bounds = array<i64: 1, 1, 128>}, {transform_indices = @transform_4, window_bounds = array<i64: 1, 1, 128>}]} {
    %c0 = arith.constant 0 : index
    %c0_0 = arith.constant 0 : index
    %c0_1 = arith.constant 0 : index
    %0 = vector.load %arg1[%c0, %c0_0, %c0_1] : memref<1x16x64xf32, #tpu.memory_space<vmem>>, vector<1x16x64xf32>
    %1 = vector.shape_cast %0 : vector<1x16x64xf32> to vector<16x64xf32>
    %2 = arith.truncf %1 : vector<16x64xf32> to vector<16x64xbf16>
    %cst = arith.constant 0.000000e+00 : bf16
    %3 = vector.broadcast %cst : bf16 to vector<1x64xbf16>
    %4 = vector.extract_strided_slice %2 {offsets = [0, 0], sizes = [15, 64], strides = [1, 1]} : vector<16x64xbf16> to vector<15x64xbf16>
    %5 = tpu.concatenate %3, %4 in 0 : vector<1x64xbf16>, vector<15x64xbf16> -> vector<16x64xbf16>
    %6 = vector.extract_strided_slice %2 {offsets = [1, 0], sizes = [15, 64], strides = [1, 1]} : vector<16x64xbf16> to vector<15x64xbf16>
    %7 = tpu.concatenate %6, %3 in 0 : vector<15x64xbf16>, vector<1x64xbf16> -> vector<16x64xbf16>
    %cst_2 = arith.constant 0.000000e+00 : f32
    %8 = vector.broadcast %cst_2 : f32 to vector<16x128xf32>
    %c0_3 = arith.constant 0 : index
    %c0_4 = arith.constant 0 : index
    %c0_5 = arith.constant 0 : index
    %9 = vector.load %arg2[%c0_3, %c0_4, %c0_5] : memref<3x64x128xbf16, #tpu.memory_space<vmem>>, vector<1x64x128xbf16>
    %10 = vector.shape_cast %9 : vector<1x64x128xbf16> to vector<64x128xbf16>
    %cst_6 = arith.constant dense<0.000000e+00> : vector<16x128xf32>
    %11 = tpu.matmul %5, %10, %cst_6 {dimension_numbers = #tpu.dot_dimension_numbers<[1], [0], [0], [1], [0, 0, 1, 1], [], []>} : vector<16x64xbf16>, vector<64x128xbf16>, vector<16x128xf32> -> vector<16x128xf32>
    %12 = arith.addf %8, %11 : vector<16x128xf32>
    %c1 = arith.constant 1 : index
    %c0_7 = arith.constant 0 : index
    %c0_8 = arith.constant 0 : index
    %13 = vector.load %arg2[%c1, %c0_7, %c0_8] : memref<3x64x128xbf16, #tpu.memory_space<vmem>>, vector<1x64x128xbf16>
    %14 = vector.shape_cast %13 : vector<1x64x128xbf16> to vector<64x128xbf16>
    %cst_9 = arith.constant dense<0.000000e+00> : vector<16x128xf32>
    %15 = tpu.matmul %2, %14, %cst_9 {dimension_numbers = #tpu.dot_dimension_numbers<[1], [0], [0], [1], [0, 0, 1, 1], [], []>} : vector<16x64xbf16>, vector<64x128xbf16>, vector<16x128xf32> -> vector<16x128xf32>
    %16 = arith.addf %12, %15 : vector<16x128xf32>
    %c2 = arith.constant 2 : index
    %c0_10 = arith.constant 0 : index
    %c0_11 = arith.constant 0 : index
    %17 = vector.load %arg2[%c2, %c0_10, %c0_11] : memref<3x64x128xbf16, #tpu.memory_space<vmem>>, vector<1x64x128xbf16>
    %18 = vector.shape_cast %17 : vector<1x64x128xbf16> to vector<64x128xbf16>
    %cst_12 = arith.constant dense<0.000000e+00> : vector<16x128xf32>
    %19 = tpu.matmul %7, %18, %cst_12 {dimension_numbers = #tpu.dot_dimension_numbers<[1], [0], [0], [1], [0, 0, 1, 1], [], []>} : vector<16x64xbf16>, vector<64x128xbf16>, vector<16x128xf32> -> vector<16x128xf32>
    %20 = arith.addf %16, %19 : vector<16x128xf32>
    %21 = arith.truncf %20 : vector<16x128xf32> to vector<16x128xbf16>
    %c0_13 = arith.constant 0 : index
    %c0_14 = arith.constant 0 : index
    %c0_15 = arith.constant 0 : index
    %22 = vector.load %arg3[%c0_13, %c0_14, %c0_15] : memref<1x16x128xbf16, #tpu.memory_space<vmem>>, vector<1x16x128xbf16>
    %23 = vector.shape_cast %22 : vector<1x16x128xbf16> to vector<16x128xbf16>
    %24 = vector.shape_cast %21 : vector<16x128xbf16> to vector<1x16x128xbf16>
    tpu.vector_store %arg3[%c0_13, %c0_14, %c0_15], %24 {strides = array<i32>} : memref<1x16x128xbf16, #tpu.memory_space<vmem>>, vector<1x16x128xbf16>,
    %cst_16 = arith.constant dense<0.000000e+00> : vector<128xf32>
    %25 = vector.multi_reduction <add>, %20, %cst_16 [0] : vector<16x128xf32> to vector<128xf32>
    %26 = vector.shape_cast %25 : vector<128xf32> to vector<1x128xf32>
    %c0_17 = arith.constant 0 : index
    %c0_18 = arith.constant 0 : index
    %c0_19 = arith.constant 0 : index
    %27 = vector.load %arg4[%c0_17, %c0_18, %c0_19] : memref<1x1x128xf32, #tpu.memory_space<vmem>>, vector<1x1x128xf32>
    %28 = vector.shape_cast %27 : vector<1x1x128xf32> to vector<1x128xf32>
    %29 = vector.shape_cast %26 : vector<1x128xf32> to vector<1x1x128xf32>
    tpu.vector_store %arg4[%c0_17, %c0_18, %c0_19], %29 {strides = array<i32>} : memref<1x1x128xf32, #tpu.memory_space<vmem>>, vector<1x1x128xf32>,
    %30 = arith.mulf %20, %20 : vector<16x128xf32>
    %cst_20 = arith.constant dense<0.000000e+00> : vector<128xf32>
    %31 = vector.multi_reduction <add>, %30, %cst_20 [0] : vector<16x128xf32> to vector<128xf32>
    %32 = vector.shape_cast %31 : vector<128xf32> to vector<1x128xf32>
    %c0_21 = arith.constant 0 : index
    %c0_22 = arith.constant 0 : index
    %c0_23 = arith.constant 0 : index
    %33 = vector.load %arg5[%c0_21, %c0_22, %c0_23] : memref<1x1x128xf32, #tpu.memory_space<vmem>>, vector<1x1x128xf32>
    %34 = vector.shape_cast %33 : vector<1x1x128xf32> to vector<1x128xf32>
    %35 = vector.shape_cast %32 : vector<1x128xf32> to vector<1x1x128xf32>
    tpu.vector_store %arg5[%c0_21, %c0_22, %c0_23], %35 {strides = array<i32>} : memref<1x1x128xf32, #tpu.memory_space<vmem>>, vector<1x1x128xf32>,
    return
  }
  func.func @transform_0(%arg0: i32) -> (i32, i32, i32) {
    %c0_i32 = arith.constant 0 : i32
    %c0_i32_0 = arith.constant 0 : i32
    %c0_i32_1 = arith.constant 0 : i32
    return %arg0, %c0_i32, %c0_i32_0 : i32, i32, i32
  }
  func.func @transform_1(%arg0: i32) -> (i32, i32, i32) {
    %c0_i32 = arith.constant 0 : i32
    %c0_i32_0 = arith.constant 0 : i32
    %c0_i32_1 = arith.constant 0 : i32
    %c0_i32_2 = arith.constant 0 : i32
    return %c0_i32, %c0_i32_0, %c0_i32_1 : i32, i32, i32
  }
  func.func @transform_2(%arg0: i32) -> (i32, i32, i32) {
    %c0_i32 = arith.constant 0 : i32
    %c0_i32_0 = arith.constant 0 : i32
    %c0_i32_1 = arith.constant 0 : i32
    return %arg0, %c0_i32, %c0_i32_0 : i32, i32, i32
  }
  func.func @transform_3(%arg0: i32) -> (i32, i32, i32) {
    %c0_i32 = arith.constant 0 : i32
    %c0_i32_0 = arith.constant 0 : i32
    %c0_i32_1 = arith.constant 0 : i32
    return %arg0, %c0_i32, %c0_i32_0 : i32, i32, i32
  }
  func.func @transform_4(%arg0: i32) -> (i32, i32, i32) {
    %c0_i32 = arith.constant 0 : i32
    %c0_i32_0 = arith.constant 0 : i32
    %c0_i32_1 = arith.constant 0 : i32
    return %arg0, %c0_i32, %c0_i32_0 : i32, i32, i32
  }
}

</mosaic_0001>

<bundles_post_ra>
// kernel: tpu_custom_call.1
= control target key start
LH: loop header
LB: loop body
LE: loop exit
PB: predicated region body
PF: predicated region fallthrough
CT: control target
= control target key end

     0   :  { %10 = vsyncpa [#allocation3], 0  ;;  %s1416_s0 = inlined_call_operand.hbm [shape: f32[2,16,64], index: 0, kind: input, shape index: {}]   ;;  %s1417_s1 = inlined_call_operand.hbm [shape: bf16[3,64,128], index: 1, kind: input, shape index: {}]   ;;  %s1418_s2 = inlined_call_operand.hbm [shape: bf16[2,16,128], index: 2, kind: output, shape index: {0}]   ;;  %s1419_s3 = inlined_call_operand.hbm [shape: f32[2,1,128], index: 3, kind: output, shape index: {1}]   ;;  %s1420_s4 = inlined_call_operand.hbm [shape: f32[2,1,128], index: 4, kind: output, shape index: {2}]  }
   0x1   :  { %12 = vsyncpa [#allocation3 + $0x1], 0 }
   0x2   :  { %13 = vsyncpa [#allocation6], 0 }
   0x3   :  { %14 = vsyncpa [#allocation4], 0 }
   0x4   :  { %16 = vsyncpa [#allocation4 + $0x1], 0 }
   0x5   :  { %17 = vsyncpa [#allocation9], 0 }
   0x6   :  { %19 = vsyncpa [#allocation9 + $0x1], 0  ;;  %s1130_s15 = smov 0   ;;  %s1132_s16 = smov 0  }
   0x7   :  { %s1134_s17 = smov 0   ;;  %s1136_s18 = smov 0  }
   0x8 LB: > { %s1151_s19 = sadd.s32 4294967295, %s1090_s18   ;;  %s714_s20 = sadd.s32 4294967294, %s1090_s18   ;;  %s1090_s18 = sphi %s1136_s18, %s1442_s18   ;;  %s1086_s17 = sphi %s1134_s17, %s1441_s17   ;;  %s1082_s16 = sphi %s1132_s16, %s1440_s16   ;;  %s1078_s15 = sphi %s1130_s15, %s1439_s15  }
   0x9   : > { %p45_p0 = scmp.ne.s32.totalorder %s1082_s16, %s1078_s15  ;;  %p1421_p1 = scmp.eq.s32.totalorder %s1151_s19, 0 }
   0xa   : > { %p96_p3 = scmp.eq.s32.totalorder %s714_s20, 1  ;;  %p715_p5 = scmp.ge.s32.totalorder %s1090_s18, 1 }
   0xb   : > { %p1162_p4 = por %p1421_p1, %p45_p0  ;;  %p155_p7 = scmp.lt.s32.totalorder %s1090_s18, 3 }
   0xc   : > { %p1167_p6 = por %p96_p3, %p45_p0  ;;  %s1092_s24 = smov [#allocation5]  }
   0xd   : > { %s1424_s21 = scalar_select %p1162_p4, 1, 0 }
   0xe   : > { %s1425_s22 = scalar_select %p1167_p6, 1, 0 }
   0xf   : > { %p1172_p8 = pnand %p715_p5, %p155_p7  ;;  %s167_s25 = sshll.u32 %s1092_s24, 4  ;;  %s1176_s25 = int_to_ptr.vmem [resolvable:$true] %s167_s25 }
  0x10   : > { %s1188_s27 = sadd.s32 1, %s1090_s18   ;;  %s32_s28 = sadd.s32 1, %s1086_s17 }
  0x11   : > { %s1426_s23 = scalar_select %p1172_p8, 1, 0 }
  0x12   : > { %p827_p9 = pneg %p1172_p8  ;;  %s29_s29 = ssub.s32 %s1090_s18, %s1188_s27 }
  0x13   : > { %s902_s6 = scalar_lea.hbm %s1417_s1, 1536 }
  0x14   : > { %p1183_p11 = pnand %p827_p9, %p1421_p1  ;;  %p903_p12 = scmp.ne.s32.totalorder %s1417_s1, %s902_s6 }
  0x15   : > { %p909_p5 = scmp.lt.u32.totalorder %s902_s6, %s1417_s1 }
  0x16   : > { %p904_p13 = pneg %p1183_p11 }
  0x18   : > { %p905_p0 = pnand %p904_p13, %p903_p12 }
  0x1a   : > { %p906_p3 = pneg %p905_p0 }
  0x1c   : > { %p911_p7 = pnand %p909_p5, %p906_p3 }
  0x1e   : > { %914 = shalt.err (!%p911_p7)
}
  0x1f   : > { %s915_s11 = scalar_lea.vmem %s1176_s25, 1536  ;;  %p923_p2 = scmp.lt.s32.totalorder %s1176_s25, %s1176_s25 }
  0x20   : > { %p916_p9 = scmp.ne.s32.totalorder %s1176_s25, %s915_s11  ;;  %p924_p6 = scmp.lt.s32.totalorder %s915_s11, %s915_s11 }
  0x22   : > { %p918_p10 = pnand %p916_p9, %p904_p13  ;;  %p925_p4 = por %p924_p6, %p923_p2 }
  0x24   : > { %p919_p1 = pneg %p918_p10 }
  0x26   : > { %p926_p8 = pnand %p925_p4, %p919_p1 }
  0x28   : > { %929 = shalt.err (!%p926_p8)
}
  0x29   : > { %s1093_s12 = smov 64   ;;  %s1094_s13 = smov 4  }
  0x2a   : > { %830 = dma.hbm_to_vmem [thread:$0]  (!%p1183_p11), %s1417_s1, 1536, %s1176_s25, [#allocation6], %s1093_s12, %s1093_s12, %s1094_s13  }
  0x2b   : > { %p30_p2 = scmp.eq.s32.totalorder %s29_s29, 0  ;;  %p39_p1 = scmp.ne.s32.totalorder %s1086_s17, %s1082_s16 }
  0x2c   : > { %p40_p4 = scmp.eq.s32.totalorder %s1090_s18, 0  ;;  %p846_p6 = scmp.lt.s32.totalorder %s1090_s18, 2 }
  0x2d   : > { %s1219_s30 = scalar_select %p30_p2, %s1086_s17, %s32_s28  }
  0x2e   : > { %p41_p8 = por %p40_p4, %p39_p1  ;;  %p1428_p10 = scmp.eq.s32.totalorder %s1151_s19, 1 }
  0x2f   : > { %s181_s6 = sand.u32 1, %s1086_s17   ;;  %s749_s7 = sshll.u32 %s1090_s18, 8 }
  0x30   : > { %p1223_p12 = por %p1428_p10, %p39_p1  ;;  %s718_s8 = sshll.u32 %s181_s6, 4 }
  0x31   : > { %s1232_s10 = scalar_lea.hbm %s1416_s0, %s749_s7  ;;  %s185_s25 = scalar_lea.vmem [#allocation2], %s718_s8 }
  0x32   : > { %s192_s28 = sshll.u32 %s185_s25, 4  ;;  %p1234_p11 = pnand %p846_p6, %p41_p8  ;;  %s1238_s28 = int_to_ptr.vmem [resolvable:$true] %s192_s28 }
  0x33   : > { %s1240_s11 = scalar_lea.sflag [#allocation3], %s181_s6  ;;  %s930_s12 = scalar_lea.hbm %s1232_s10, 256 }
  0x34   : > { %p931_p13 = scmp.ne.s32.totalorder %s1232_s10, %s930_s12  ;;  %p932_p0 = pneg %p1234_p11 }
  0x35   : > { %s935_s24 = scalar_lea.hbm %s1416_s0, 512  ;;  %p936_p7 = scmp.lt.u32.totalorder %s1232_s10, %s1416_s0 }
  0x36   : > { %p933_p3 = pnand %p932_p0, %p931_p13  ;;  %p937_p9 = scmp.lt.u32.totalorder %s935_s24, %s930_s12 }
  0x37   : > { %p939_p1 = scmp.lt.u32.totalorder %s930_s12, %s1232_s10 }
  0x38   : > { %p934_p5 = pneg %p933_p3  ;;  %p938_p2 = por %p937_p9, %p936_p7 }
  0x3a   : > { %p940_p4 = por %p939_p1, %p938_p2 }
  0x3c   : > { %p941_p6 = pnand %p940_p4, %p934_p5 }
  0x3e   : > { %944 = shalt.err (!%p941_p6)
}
  0x3f   : > { %s945_s6 = scalar_lea.vmem %s1238_s28, 256  ;;  %s1095_s26 = smov [#allocation2]  }
  0x40   : > { %p946_p8 = scmp.ne.s32.totalorder %s1238_s28, %s945_s6  ;;  %s950_s9 = sshll.u32 %s1095_s26, 4  ;;  %s951_s9 = int_to_ptr.vmem [resolvable:$false] %s950_s9 }
  0x41   : > { %s952_s25 = scalar_lea.vmem %s951_s9, 512  ;;  %p953_p3 = scmp.lt.s32.totalorder %s1238_s28, %s951_s9 }
  0x42   : > { %p948_p10 = pnand %p946_p8, %p932_p0  ;;  %p954_p7 = scmp.lt.s32.totalorder %s952_s25, %s945_s6 }
  0x44   : > { %p949_p13 = pneg %p948_p10  ;;  %p955_p9 = por %p954_p7, %p953_p3 }
  0x46   : > { %p956_p2 = pnand %p955_p9, %p949_p13 }
  0x48   : > { %959 = shalt.err (!%p956_p2)
}
  0x49   : > { %s1096_s12 = smov 128   ;;  %s1097_s13 = smov 8  }
  0x4a   : > { %834 = dma.hbm_to_vmem [thread:$0]  (!%p1234_p11), %s1232_s10, 256, %s1238_s28, %s1240_s11, %s1096_s12, %s1096_s12, %s1097_s13  }
  0x4b   : > { %p1431_p0 = scmp.ne.s32.totalorder %s1426_s23, 0 }
  0x4c   : > { %s1271_s14 = sand.u32 (!%p1431_p0), 1, %s1082_s16   ;;  %p1432_p5 = scmp.ne.s32.totalorder (!%p1431_p0), %s1424_s21, 0 }
  0x4d   : > { %204 = sbr.rel (%p1431_p0) target bundleno = 404 (0x194), region = 28  ;;  %s722_s24 = sshll.u32 (!%p1431_p0), %s1271_s14, 4 }
  0x4e   : > { %s207_s7 = scalar_lea.sflag (!%p1431_p0), [#allocation3], %s1271_s14  ;;  %s210_s8 = scalar_lea.vmem (!%p1431_p0), [#allocation2], %s722_s24 }
  0x54   : > { %1061 = dma.done.wait (%p1432_p5), %s207_s7, 256  }
  0x55   : > { %1063 = vsyncadd (%p1432_p5), %s207_s7, 4294967040  ;;  %p1433_p1 = scmp.eq.s32.totalorder %s1151_s19, 0 }
  0x57   : > { %1065 = dma.done.wait (%p1433_p1), [#allocation6], 1536   ;;  %p1434_p11 = pmov %p1433_p1 }
  0x58   : > { %v1098_v0 = vmov 0.0   ;;  %vm1099_vm0 = vmmov 0   ;;  %v890_v1 = vld [vmem:[#allocation5] sm:$0xff]   ;;  %v891_v2 = vld [vmem:[#allocation5 + $0x8] sm:$0xff]   ;;  %vm259_vm1 = vcmask 1040384   ;;  %v892_v6 = vld [vmem:[#allocation5 + $0x10] sm:$0xff]  }
  0x59   : > { %1067 = vsyncadd (%p1434_p11), [#allocation6], 4294965760  ;;  %785 = vmatprep.subr.bf16.mxu0 %v1098_v0  ;;  %773 = vmatprep.subr.bf16.mxu1 %v1098_v0  ;;  %v894_v3 = vld [vmem:[#allocation5 + $0x20] sm:$0xff]   ;;  %v249_v5 = vld [vmem:[%s210_s8 + $0x8] sm:$0xff]  ;;  %vm260_vm2 = vsmask.f32 256 }
  0x5a   : > { %793 = vmatprep.mubr.msk.bf16.mxu0 %vm1099_vm0, %v1098_v0  ;;  %781 = vmatprep.mubr.msk.bf16.mxu1 %vm1099_vm0, %v1098_v0  ;;  %v248_v4 = vld [vmem:[%s210_s8] sm:$0xff]  ;;  %v896_v8 = vld [vmem:[#allocation5 + $0x28] sm:$0xff]   ;;  %vm1285_vm3 = vmand %vm259_vm1, %vm260_vm2  ;;  %vm311_vm4 = vcmask 523264   ;;  %vm266_vm5 = vcmask 1047552   ;;  %vm267_vm6 = vsmask.f32 7424 }
  0x5b   : > { %786 = vmatpush3.bf16.msra.mxu0 %v890_v1  ;;  %774 = vmatpush3.bf16.msra.mxu1 %v894_v3  ;;  %v250_v7 = vpack.c.bf16 %v249_v5, %v248_v4  ;;  %v893_v12 = vld [vmem:[#allocation5 + $0x18] sm:$0xff]   ;;  %v898_v14 = vld [vmem:[#allocation5 + $0x30] sm:$0xff]   ;;  %v895_v17 = vld [vmem:[#allocation5 + $0x40] sm:$0xff]   ;;  %s724_s21 = sshll.u32 %s1271_s14, 3  ;;  %s752_s23 = sshll.u32 %s1151_s19, 7 }
  0x5c   : > { %787 = vmatprep.subr.bf16.mxu0 %v1098_v0  ;;  %775 = vmatprep.subr.bf16.mxu1 %v1098_v0  ;;  %v900_v18 = vld [vmem:[#allocation5 + $0x38] sm:$0xff]   ;;  %v897_v19 = vld [vmem:[#allocation5 + $0x48] sm:$0xff]   ;;  %v899_v21 = vld [vmem:[#allocation5 + $0x50] sm:$0xff]   ;;  %s234_s10 = scalar_lea.vmem [#allocation7], %s724_s21  ;;  %s1300_s6 = scalar_lea.hbm %s1418_s2, %s752_s23 }
  0x5d   : > { %v252_v9 = vshrl.u32 %v250_v7, 16  ;;  %v255_v10 = vshll.u32 %v250_v7, 16  ;;  %v901_v22 = vld [vmem:[#allocation5 + $0x58] sm:$0xff]   ;;  %vm268_vm7 = vmand %vm266_vm5, %vm267_vm6  ;;  %s552_s28 = sshll.u32 %s234_s10, 4  ;;  %s531_s26 = scalar_lea.sflag [#allocation4], %s1271_s14  ;;  %s1302_s28 = int_to_ptr.vmem [resolvable:$true] %s552_s28 }
  0x5e   : > { %s960_s9 = scalar_lea.vmem %s1302_s28, 128  ;;  %s1100_s25 = smov [#allocation7]  }
  0x5f   : > { %788 = vmatpush3.bf16.msra.mxu0 %v891_v2  ;;  %v254_v13 = vrot.slane %v252_v9, 7  ;;  %776 = vmatpush3.bf16.msra.mxu1 %v896_v8  ;;  %v263_v20 = vrot.slane %v255_v10, 1  ;;  %p961_p4 = scmp.ne.s32.totalorder %s1302_s28, %s960_s9  ;;  %s964_s12 = sshll.u32 %s1100_s25, 4  ;;  %s965_s12 = int_to_ptr.vmem [resolvable:$false] %s964_s12 }
  0x60   : > { %789 = vmatprep.subr.bf16.mxu0 %v1098_v0  ;;  %777 = vmatprep.subr.bf16.mxu1 %v1098_v0  ;;  %s966_s13 = scalar_lea.vmem %s965_s12, 256  ;;  %p967_p10 = scmp.lt.s32.totalorder %s1302_s28, %s965_s12 }
  0x61   : > { %v257_v15 = vor.u32 %v255_v10, %v254_v13  ;;  %v264_v23 = vor.u32 %v263_v20, %v252_v9  ;;  %p962_p6 = pnand %p961_p4, %p1223_p12  ;;  %p968_p13 = scmp.lt.s32.totalorder %s966_s13, %s960_s9 }
  0x63   : > { %790 = vmatpush3.bf16.msra.mxu0 %v892_v6  ;;  %v262_v16 = vsel %vm1285_vm3, 0, %v257_v15  ;;  %778 = vmatpush3.bf16.msra.mxu1 %v898_v14  ;;  %v269_v24 = vsel %vm268_vm7, %v264_v23, 0  ;;  %p963_p8 = pneg %p962_p6  ;;  %p969_p3 = por %p968_p13, %p967_p10 }
  0x64   : > { %791 = vmatprep.subr.bf16.mxu0 %v1098_v0  ;;  %779 = vmatprep.subr.bf16.mxu1 %v1098_v0 }
  0x65   : > { %p970_p7 = pnand %p969_p3, %p963_p8 }
  0x67   : > { %792 = vmatpush3.bf16.msra.mxu0 %v893_v12  ;;  %780 = vmatpush3.bf16.msra.mxu1 %v900_v18 }
  0x68   : > { %797 = vmatprep.subr.bf16.mxu0 %v1098_v0 }
  0x6a   : > { %794 = vmatmul.mubr.msk.bf16.vlgmr.msra.gmra.mrb[0].mxu0 %vm311_vm4, %v262_v16  ;;  %782 = vmatmul.mubr.msk.bf16.vlgmr.msra.gmra.mrb[0].mxu1 %vm311_vm4, %v250_v7 }
  0x6b   : > { %798 = vmatpush3.bf16.msra.mxu0 %v895_v17  ;;  %805 = vmatprep.mubr.msk.bf16.mxu0 %vm1099_vm0, %v1098_v0 }
  0x6c   : > { %799 = vmatprep.subr.bf16.mxu0 %v1098_v0 }
  0x6f   : > { %800 = vmatpush3.bf16.msra.mxu0 %v897_v19 }
  0x70   : > { %801 = vmatprep.subr.bf16.mxu0 %v1098_v0 }
  0x73   : > { %802 = vmatpush3.bf16.msra.mxu0 %v899_v21 }
  0x74   : > { %803 = vmatprep.subr.bf16.mxu0 %v1098_v0 }
  0x77   : > { %804 = vmatpush3.bf16.msra.mxu0 %v901_v22 }
  0x7a   : > { %806 = vmatmul.mubr.msk.bf16.vlgmr.msra.gmra.mrb[0].mxu0 %vm311_vm4, %v269_v24 }
 0x13d   : > { %v348_v25 = vpop.f32.mrb[0].mxu1 }
 0x13e   : > { %v783_v26 = vpop.f32.mrb[1].mxu1 }
 0x13f   : > { %v351_v27 = vpop.f32.mrb[2].mxu1 }
 0x140   : > { %v784_v28 = vpop.f32.mrb[3].mxu1 }
 0x14d   : > { %v493_v29 = vpop.f32.mrb[0].mxu0 }
 0x14e   : > { %v809_v30 = vadd.f32 %v493_v29, %v348_v25  ;;  %v807_v31 = vpop.f32.mrb[1].mxu0 }
 0x14f   : > { %v496_v32 = vpop.f32.mrb[2].mxu0 }
 0x150   : > { %v810_v33 = vadd.f32 %v496_v32, %v351_v27  ;;  %v808_v34 = vpop.f32.mrb[3].mxu0  ;;  %v520_v35 = vmul.f32 %v809_v30, %v809_v30 }
 0x152   : > { %v756_v36 = vpack.c.bf16 %v810_v33, %v809_v30  ;;  %v512_v37 = vadd.f32 %v810_v33, %v809_v30  ;;  %v521_v38 = vmul.f32 %v810_v33, %v810_v33 }
 0x154   : > { %757 = vst [vmem:[%s234_s10] sm:$0xff] %v756_v36   ;;  %v513_v39 = vrot.slane %v512_v37, 4  ;;  %v522_v40 = vadd.f32 %v521_v38, %v520_v35 }
 0x155   : > { %973 = shalt.err (!%p970_p7)
}
 0x156   : > { %s974_s24 = scalar_lea.hbm %s1300_s6, 128  ;;  %s978_s21 = scalar_lea.hbm %s1418_s2, 256 }
 0x157   : > { %p975_p9 = scmp.ne.s32.totalorder %s1300_s6, %s974_s24  ;;  %p979_p5 = scmp.lt.u32.totalorder %s1300_s6, %s1418_s2 }
 0x158   : > { %p980_p1 = scmp.lt.u32.totalorder %s978_s21, %s974_s24  ;;  %p982_p4 = scmp.lt.u32.totalorder %s974_s24, %s1300_s6 }
 0x159   : > { %p976_p2 = pnand %p975_p9, %p1223_p12 }
 0x15a   : > { %p981_p11 = por %p980_p1, %p979_p5 }
 0x15b   : > { %p977_p0 = pneg %p976_p2 }
 0x15c   : > { %p983_p6 = por %p982_p4, %p981_p11 }
 0x15e   : > { %p984_p8 = pnand %p983_p6, %p977_p0 }
 0x160   : > { %987 = shalt.err (!%p984_p8)
}
 0x161   : > { %s1101_s29 = smov 64   ;;  %s1102_s11 = smov 4   ;;  %v514_v41 = vadd.f32 %v513_v39, %v512_v37  ;;  %v523_v42 = vrot.slane %v522_v40, 4 }
 0x162   : > { %821 = dma.vmem_to_hbm [thread:$0]  (%p1223_p12), %s1302_s28, 128, %s1300_s6, %s531_s26, %s1101_s29, %s1101_s29, %s1102_s11  }
 0x163   : > { %v515_v43 = vrot.slane %v514_v41, 2  ;;  %v524_v44 = vadd.f32 %v523_v42, %v522_v40  ;;  %s535_s9 = sand.u32 1, %s1151_s19   ;;  %s745_s25 = sshll.u32 %s1151_s19, 4 }
 0x164   : > { %s240_s12 = scalar_lea.vmem [#allocation8], %s1271_s14  ;;  %s246_s24 = scalar_lea.vmem [#allocation10], %s1271_s14 }
 0x165   : > { %v516_v45 = vadd.f32 %v515_v43, %v514_v41  ;;  %v525_v46 = vrot.slane %v524_v44, 2  ;;  %s568_s13 = sshll.u32 %s240_s12, 4  ;;  %s581_s7 = sshll.u32 %s246_s24, 4  ;;  %s1339_s13 = int_to_ptr.vmem [resolvable:$true] %s568_s13  ;;  %s1346_s7 = int_to_ptr.vmem [resolvable:$true] %s581_s7 }
 0x166   : > { %s1337_s6 = scalar_lea.hbm %s1419_s3, %s745_s25  ;;  %s1344_s21 = scalar_lea.hbm %s1420_s4, %s745_s25 }
 0x167   : > { %v517_v47 = vrot.slane %v516_v45, 1  ;;  %v526_v48 = vadd.f32 %v525_v46, %v524_v44  ;;  %s1348_s23 = scalar_lea.sflag [#allocation9], %s535_s9  ;;  %s988_s10 = scalar_lea.vmem %s1339_s13, 16 }
 0x168   : > { %p989_p10 = scmp.ne.s32.totalorder %s1339_s13, %s988_s10  ;;  %s1103_s29 = smov [#allocation8]  }
 0x169   : > { %v527_v49 = vrot.slane %v526_v48, 1  ;;  %v518_v50 = vadd.f32 %v517_v47, %v516_v45  ;;  %s992_s11 = sshll.u32 %s1103_s29, 4  ;;  %s993_s11 = int_to_ptr.vmem [resolvable:$false] %s992_s11 }
 0x16a   : > { %p990_p13 = pnand %p989_p10, %p1223_p12  ;;  %s994_s8 = scalar_lea.vmem %s993_s11, 32 }
 0x16b   : > { %519 = vst [vmem:[%s240_s12] sm:$0x1] %v518_v50  ;;  %v528_v51 = vadd.f32 %v527_v49, %v526_v48  ;;  %p995_p7 = scmp.lt.s32.totalorder %s1339_s13, %s993_s11  ;;  %p996_p9 = scmp.lt.s32.totalorder %s994_s8, %s988_s10 }
 0x16c   : > { %p991_p3 = pneg %p990_p13 }
 0x16d   : > { %p997_p2 = por %p996_p9, %p995_p7 }
 0x16f   : > { %p998_p0 = pnand %p997_p2, %p991_p3 }
 0x171   : > { %1001 = shalt.err (!%p998_p0)
}
 0x172   : > { %s1002_s9 = scalar_lea.hbm %s1337_s6, 16  ;;  %s1006_s28 = scalar_lea.hbm %s1419_s3, 32 }
 0x173   : > { %p1003_p5 = scmp.ne.s32.totalorder %s1337_s6, %s1002_s9  ;;  %p1007_p4 = scmp.lt.u32.totalorder %s1337_s6, %s1419_s3 }
 0x174   : > { %p1008_p6 = scmp.lt.u32.totalorder %s1006_s28, %s1002_s9  ;;  %p1010_p10 = scmp.lt.u32.totalorder %s1002_s9, %s1337_s6 }
 0x175   : > { %p1004_p1 = pnand %p1003_p5, %p1223_p12 }
 0x176   : > { %p1009_p8 = por %p1008_p6, %p1007_p4 }
 0x177   : > { %p1005_p11 = pneg %p1004_p1 }
 0x178   : > { %p1011_p13 = por %p1010_p10, %p1009_p8 }
 0x17a   : > { %p1012_p3 = pnand %p1011_p13, %p1005_p11 }
 0x17c   : > { %1015 = shalt.err (!%p1012_p3)
}
 0x17d   : > { %822 = dma.vmem_to_hbm [thread:$0]  (%p1223_p12), %s1339_s13, 16, %s1337_s6, %s1348_s23   ;;  %529 = vst [vmem:[%s246_s24] sm:$0x1] %v528_v51 }
 0x17e   : > { %s1016_s10 = scalar_lea.vmem %s1346_s7, 16  ;;  %s1104_s29 = smov [#allocation10]  }
 0x17f   : > { %p1017_p7 = scmp.ne.s32.totalorder %s1346_s7, %s1016_s10  ;;  %s1020_s11 = sshll.u32 %s1104_s29, 4  ;;  %s1021_s11 = int_to_ptr.vmem [resolvable:$false] %s1020_s11 }
 0x180   : > { %s1022_s8 = scalar_lea.vmem %s1021_s11, 32  ;;  %p1023_p0 = scmp.lt.s32.totalorder %s1346_s7, %s1021_s11 }
 0x181   : > { %p1018_p9 = pnand %p1017_p7, %p1223_p12  ;;  %p1024_p5 = scmp.lt.s32.totalorder %s1022_s8, %s1016_s10 }
 0x183   : > { %p1019_p2 = pneg %p1018_p9  ;;  %p1025_p1 = por %p1024_p5, %p1023_p0 }
 0x185   : > { %p1026_p11 = pnand %p1025_p1, %p1019_p2 }
 0x187   : > { %1029 = shalt.err (!%p1026_p11)
}
 0x188   : > { %s1030_s14 = scalar_lea.hbm %s1344_s21, 16  ;;  %s1034_s6 = scalar_lea.hbm %s1420_s4, 32 }
 0x189   : > { %p1031_p4 = scmp.ne.s32.totalorder %s1344_s21, %s1030_s14  ;;  %p1035_p10 = scmp.lt.u32.totalorder %s1344_s21, %s1420_s4 }
 0x18a   : > { %p1036_p13 = scmp.lt.u32.totalorder %s1034_s6, %s1030_s14  ;;  %p1038_p7 = scmp.lt.u32.totalorder %s1030_s14, %s1344_s21 }
 0x18b   : > { %p1032_p6 = pnand %p1031_p4, %p1223_p12 }
 0x18c   : > { %p1037_p3 = por %p1036_p13, %p1035_p10 }
 0x18d   : > { %p1033_p8 = pneg %p1032_p6 }
 0x18e   : > { %p1039_p9 = por %p1038_p7, %p1037_p3 }
 0x190   : > { %p1040_p2 = pnand %p1039_p9, %p1033_p8 }
 0x192   : > { %1043 = shalt.err (!%p1040_p2)
}
 0x193   : > { %823 = dma.vmem_to_hbm [thread:$0]  (%p1223_p12), %s1346_s7, 16, %s1344_s21, %s1348_s23  }
 0x194 PF: > { %s593_s12 = sand.u32 1, %s1078_s15   ;;  %p1437_p0 = scmp.ne.s32.totalorder %s1425_s22, 0 }
 0x195   : > { %p1438_p5 = scmp.ge.s32.totalorder %s1090_s18, 2  ;;  %s594_s28 = scalar_lea.sflag [#allocation4], %s593_s12 }
 0x197   : > { %p836_p1 = pnand %p1438_p5, %p1437_p0 }
 0x199   : > { %1069 = dma.done.wait (!%p836_p1), %s594_s28, 128  }
 0x19a   : > { %1071 = vsyncadd (!%p836_p1), %s594_s28, 4294967168  ;;  %s602_s19 = sand.u32 1, %s714_s20  }
 0x19b   : > { %s603_s26 = scalar_lea.sflag [#allocation9], %s602_s19 }
 0x19c   : > { %1073 = dma.done.wait (!%p836_p1), %s603_s26, 32  }
 0x19d   : > { %1075 = vsyncadd (!%p836_p1), %s603_s26, 4294967264  ;;  %p22_p12 = scmp.ge.s32.totalorder %s1188_s27, 4   ;;  %s1439_s15 = smov %s1082_s16 }
 0x19e   : > { %s1440_s16 = smov %s1086_s17  ;;  %s1441_s17 = smov %s1219_s30 }
 0x19f   : > { %s1442_s18 = smov %s1188_s27  ;;  %24 = sbr.rel (!%p22_p12) target bundleno = 8 (0x8), region = 111 }
 0x1a6   :  { %615 = vsyncpa [#allocation3], 1 }
 0x1a7   :  { %617 = vsyncpa [#allocation3 + $0x1], 1 }
 0x1a8   :  { %618 = vsyncpa [#allocation6], 1 }
 0x1a9   :  { %619 = vsyncpa [#allocation4], 1 }
 0x1aa   :  { %621 = vsyncpa [#allocation4 + $0x1], 1 }
 0x1ab   :  { %622 = vsyncpa [#allocation9], 1 }
 0x1ac   :  { %624 = vsyncpa [#allocation9 + $0x1], 1 }

</bundles_post_ra>
